<compile_context>
chip_gen: v5e
topology: v5e:2x2
jax: 0.10.0
libtpu: 0.0.40
codegen_flags: <defaults>
</compile_context>

<pallas_src>
import jax
import jax.numpy as jnp
from jax.experimental import pallas as pl
from jax.experimental.pallas import tpu as pltpu

NUM_FORCE = 3   # channels [0,3) are forces, [3,C) are torques
NUM_STATS = 16  # padded scalar-output length (13 used)
NUM_QUANT = 7   # sufficient-statistic quantities reduced per channel

_STAT_NAMES = [
    "loss_mse_f", "loss_mse_t", "loss_mse", "loss_l1",
    "force_mae_mean", "force_mae_std", "torque_mae_mean", "torque_mae_std",
    "force_rmae_mean", "force_rmae_std", "torque_rmae_mean", "torque_rmae_std",
    "pcc",
]


def _criterion_kernel(pred_ref, true_ref, res_ref):
    # pred_ref / true_ref: [C, B] with B (batch) on the lane axis.
    p = pred_ref[...].astype(jnp.float32)
    t = true_ref[...].astype(jnp.float32)
    c, b = p.shape

    d = p - t
    sq = d * d           # note: sum(|d|^2) == sum(d^2), reused for MAE std
    ad = jnp.abs(d)

    # --- one fused lane reduction for all sufficient statistics -------------
    # quantities: [d^2, |d|, y, y^2, p, p*y, p^2]  -> stacked [7, C, B]
    stacked = jnp.stack([sq, ad, t, t * t, p, p * t, p * p], axis=0)
    per_channel = jnp.sum(stacked, axis=-1)                       # [7, C]
    f_sums = jnp.sum(per_channel[:, :NUM_FORCE], axis=-1,
                     keepdims=True)                               # [7, 1]
    t_sums = jnp.sum(per_channel[:, NUM_FORCE:], axis=-1,
                     keepdims=True)                               # [7, 1]

    s_sq_f, s_ad_f, s_y_f, s_y2_f, s_p_f, s_pt_f, s_p2_f = (
        [f_sums[i, 0] for i in range(NUM_QUANT)])
    s_sq_t, s_ad_t, s_y_t, s_y2_t, s_p_t, s_pt_t, s_p2_t = (
        [t_sums[i, 0] for i in range(NUM_QUANT)])

    nf = jnp.float32(NUM_FORCE * b)
    nt = jnp.float32((c - NUM_FORCE) * b)
    na = nf + nt

    # --- MSE / L1 losses (mean reduction); totals from group sums -----------
    loss_mse_f = s_sq_f / nf
    loss_mse_t = s_sq_t / nt
    loss_mse = (s_sq_f + s_sq_t) / na
    loss_l1 = (s_ad_f + s_ad_t) / na

    # --- MAE mean and unbiased std of |d| per group (single-pass form) ------
    f_mae_mean = s_ad_f / nf
    t_mae_mean = s_ad_t / nt
    f_mae_std = jnp.sqrt(
        jnp.maximum(s_sq_f - nf * f_mae_mean * f_mae_mean, 0.0) / (nf - 1.0))
    t_mae_std = jnp.sqrt(
        jnp.maximum(s_sq_t - nt * t_mae_mean * t_mae_mean, 0.0) / (nt - 1.0))

    # --- unbiased std of ground-truth force / torque -------------------------
    f_true_std = jnp.sqrt(
        jnp.maximum(s_y2_f - s_y_f * s_y_f / nf, 0.0) / (nf - 1.0))
    t_true_std = jnp.sqrt(
        jnp.maximum(s_y2_t - s_y_t * s_y_t / nt, 0.0) / (nt - 1.0))

    # --- Pearson correlation over the flattened tensors ----------------------
    sp = s_p_f + s_p_t
    st = s_y_f + s_y_t
    spt = s_pt_f + s_pt_t
    sp2 = s_p2_f + s_p2_t
    st2 = s_y2_f + s_y2_t
    top = spt - sp * st / na
    bottom = (jnp.sqrt(jnp.maximum(sp2 - sp * sp / na, 0.0)) *
              jnp.sqrt(jnp.maximum(st2 - st * st / na, 0.0)))
    pcc = top / bottom

    res_ref[0] = loss_mse_f
    res_ref[1] = loss_mse_t
    res_ref[2] = loss_mse
    res_ref[3] = loss_l1
    res_ref[4] = f_mae_mean
    res_ref[5] = f_mae_std
    res_ref[6] = t_mae_mean
    res_ref[7] = t_mae_std
    res_ref[8] = f_mae_mean / f_true_std
    res_ref[9] = f_mae_std / f_true_std
    res_ref[10] = t_mae_mean / t_true_std
    res_ref[11] = t_mae_std / t_true_std
    res_ref[12] = pcc
    res_ref[13] = jnp.float32(0.0)
    res_ref[14] = jnp.float32(0.0)
    res_ref[15] = jnp.float32(0.0)


def set_criterion_forward(outputs, targets,
                          weight_dict=None,
                          losses=("mse_f", "mse_t", "mse", "mae", "pcc", "l1")):
    """JAX/Pallas equivalent of SetCriterion.forward.

    outputs, targets: [B, 6] arrays. Returns a dict of scalar metrics matching
    the PyTorch module's keys (for the requested `losses`).
    """
    del weight_dict  # weights are not applied in forward() of the reference

    # Lane-dense layout: channels on sublanes, batch on lanes.  Do NOT pre-cast:
    # the kernel upcasts internally (halves DMA bytes for bf16 inputs).
    pred = outputs.T   # [6, B]
    true = targets.T   # [6, B]

    stats = pl.pallas_call(
        _criterion_kernel,
        out_shape=jax.ShapeDtypeStruct((NUM_STATS,), jnp.float32),
        in_specs=[
            pl.BlockSpec(memory_space=pltpu.MemorySpace.VMEM),
            pl.BlockSpec(memory_space=pltpu.MemorySpace.VMEM),
        ],
        out_specs=pl.BlockSpec(memory_space=pltpu.MemorySpace.SMEM),
    )(pred, true)

    by_name = {name: stats[i] for i, name in enumerate(_STAT_NAMES)}

    result = {}
    for loss in losses:
        if loss == "mse":
            result["loss_mse"] = by_name["loss_mse"]
        elif loss == "mse_f":
            result["loss_mse_f"] = by_name["loss_mse_f"]
        elif loss == "mse_t":
            result["loss_mse_t"] = by_name["loss_mse_t"]
        elif loss == "l1":
            result["loss_l1"] = by_name["loss_l1"]
        elif loss == "mae":
            for k in ("force_mae_mean", "force_mae_std",
                      "torque_mae_mean", "torque_mae_std",
                      "force_rmae_mean", "force_rmae_std",
                      "torque_rmae_mean", "torque_rmae_std"):
                result[k] = by_name[k]
        elif loss == "pcc":
            result["pcc"] = by_name["pcc"]
        else:
            raise ValueError(f"do you really want to compute {loss} loss ?")
    return result


def _reference(outputs, targets):
    """Pure-JAX reference (mirrors the PyTorch semantics) for validation."""
    o = outputs.astype(jnp.float32)
    t = targets.astype(jnp.float32)
    d = o - t
    ref = {
        "loss_mse": jnp.mean(d ** 2),
        "loss_mse_f": jnp.mean(d[:, :3] ** 2),
        "loss_mse_t": jnp.mean(d[:, 3:] ** 2),
        "loss_l1": jnp.mean(jnp.abs(d)),
    }
    ad = jnp.abs(d)
    fm, fs = jnp.mean(ad[:, :3]), jnp.std(ad[:, :3], ddof=1)
    tm, ts = jnp.mean(ad[:, 3:]), jnp.std(ad[:, 3:], ddof=1)
    fts = jnp.std(t[:, :3], ddof=1)
    tts = jnp.std(t[:, 3:], ddof=1)
    ref.update({
        "force_mae_mean": fm, "force_mae_std": fs,
        "torque_mae_mean": tm, "torque_mae_std": ts,
        "force_rmae_mean": fm / fts, "force_rmae_std": fs / fts,
        "torque_rmae_mean": tm / tts, "torque_rmae_std": ts / tts,
    })
    op, tp = o.reshape(-1), t.reshape(-1)
    dp, dt = op - jnp.mean(op), tp - jnp.mean(tp)
    ref["pcc"] = jnp.sum(dp * dt) / (
        jnp.sqrt(jnp.sum(dp ** 2)) * jnp.sqrt(jnp.sum(dt ** 2)))
    return ref


if __name__ == "__main__":
    key = jax.random.PRNGKey(0)
    k1, k2 = jax.random.split(key)
    B, C = 8, 6  # [B, C] = batch x [Fx, Fy, Fz, Tx, Ty, Tz]
    outputs = jax.random.normal(k1, (B, C), dtype=jnp.float32)
    targets = jax.random.normal(k2, (B, C), dtype=jnp.float32)

    losses = set_criterion_forward(outputs, targets)
    losses = jax.tree_util.tree_map(jax.block_until_ready, losses)

    ref = _reference(outputs, targets)
    for k, v in losses.items():
        assert jnp.allclose(v, ref[k], rtol=5e-4, atol=1e-5), (k, v, ref[k])

    print("KERNEL_OK")
</pallas_src>

<mosaic_0001>
module attributes {stable_mosaic.version = 11 : i64} {
  func.func @_criterion_kernel(%arg0: memref<6x8xf32, #tpu.memory_space<vmem>>, %arg1: memref<6x8xf32, #tpu.memory_space<vmem>>, %arg2: memref<16xf32, #tpu.memory_space<smem>>) attributes {dimension_semantics = [], scalar_prefetch = 0 : i64, scratch_operands = 0 : i64, tpu.core_type = #tpu.core_type<tc>} {
    %c0 = arith.constant 0 : index
    %c0_0 = arith.constant 0 : index
    %0 = vector.load %arg0[%c0, %c0_0] : memref<6x8xf32, #tpu.memory_space<vmem>>, vector<6x8xf32>
    %c0_1 = arith.constant 0 : index
    %c0_2 = arith.constant 0 : index
    %1 = vector.load %arg1[%c0_1, %c0_2] : memref<6x8xf32, #tpu.memory_space<vmem>>, vector<6x8xf32>
    %2 = arith.subf %0, %1 : vector<6x8xf32>
    %3 = arith.mulf %2, %2 : vector<6x8xf32>
    %4 = math.absf %2 : vector<6x8xf32>
    %5 = arith.mulf %1, %1 : vector<6x8xf32>
    %6 = arith.mulf %0, %1 : vector<6x8xf32>
    %7 = arith.mulf %0, %0 : vector<6x8xf32>
    %8 = vector.shape_cast %3 : vector<6x8xf32> to vector<1x6x8xf32>
    %9 = vector.shape_cast %4 : vector<6x8xf32> to vector<1x6x8xf32>
    %10 = vector.shape_cast %1 : vector<6x8xf32> to vector<1x6x8xf32>
    %11 = vector.shape_cast %5 : vector<6x8xf32> to vector<1x6x8xf32>
    %12 = vector.shape_cast %0 : vector<6x8xf32> to vector<1x6x8xf32>
    %13 = vector.shape_cast %6 : vector<6x8xf32> to vector<1x6x8xf32>
    %14 = vector.shape_cast %7 : vector<6x8xf32> to vector<1x6x8xf32>
    %15 = tpu.concatenate %8, %9, %10, %11, %12, %13, %14 in 0 : vector<1x6x8xf32>, vector<1x6x8xf32>, vector<1x6x8xf32>, vector<1x6x8xf32>, vector<1x6x8xf32>, vector<1x6x8xf32>, vector<1x6x8xf32> -> vector<7x6x8xf32>
    %cst = arith.constant dense<0.000000e+00> : vector<7x6xf32>
    %16 = vector.multi_reduction <add>, %15, %cst [2] : vector<7x6x8xf32> to vector<7x6xf32>
    %17 = vector.extract_strided_slice %16 {offsets = [0, 0], sizes = [7, 3], strides = [1, 1]} : vector<7x6xf32> to vector<7x3xf32>
    %cst_3 = arith.constant dense<0.000000e+00> : vector<7xf32>
    %18 = vector.multi_reduction <add>, %17, %cst_3 [1] : vector<7x3xf32> to vector<7xf32>
    %19 = vector.shape_cast %18 : vector<7xf32> to vector<7x1xf32>
    %20 = vector.extract_strided_slice %16 {offsets = [0, 3], sizes = [7, 3], strides = [1, 1]} : vector<7x6xf32> to vector<7x3xf32>
    %cst_4 = arith.constant dense<0.000000e+00> : vector<7xf32>
    %21 = vector.multi_reduction <add>, %20, %cst_4 [1] : vector<7x3xf32> to vector<7xf32>
    %22 = vector.shape_cast %21 : vector<7xf32> to vector<7x1xf32>
    %23 = vector.extract_strided_slice %19 {offsets = [0, 0], sizes = [1, 1], strides = [1, 1]} : vector<7x1xf32> to vector<1x1xf32>
    %24 = vector.extract %23[0, 0] : f32 from vector<1x1xf32>
    %25 = vector.extract_strided_slice %19 {offsets = [1, 0], sizes = [1, 1], strides = [1, 1]} : vector<7x1xf32> to vector<1x1xf32>
    %26 = vector.extract %25[0, 0] : f32 from vector<1x1xf32>
    %27 = vector.extract_strided_slice %19 {offsets = [2, 0], sizes = [1, 1], strides = [1, 1]} : vector<7x1xf32> to vector<1x1xf32>
    %28 = vector.extract %27[0, 0] : f32 from vector<1x1xf32>
    %29 = vector.extract_strided_slice %19 {offsets = [3, 0], sizes = [1, 1], strides = [1, 1]} : vector<7x1xf32> to vector<1x1xf32>
    %30 = vector.extract %29[0, 0] : f32 from vector<1x1xf32>
    %31 = vector.extract_strided_slice %19 {offsets = [4, 0], sizes = [1, 1], strides = [1, 1]} : vector<7x1xf32> to vector<1x1xf32>
    %32 = vector.extract %31[0, 0] : f32 from vector<1x1xf32>
    %33 = vector.extract_strided_slice %19 {offsets = [5, 0], sizes = [1, 1], strides = [1, 1]} : vector<7x1xf32> to vector<1x1xf32>
    %34 = vector.extract %33[0, 0] : f32 from vector<1x1xf32>
    %35 = vector.extract_strided_slice %19 {offsets = [6, 0], sizes = [1, 1], strides = [1, 1]} : vector<7x1xf32> to vector<1x1xf32>
    %36 = vector.extract %35[0, 0] : f32 from vector<1x1xf32>
    %37 = vector.extract_strided_slice %22 {offsets = [0, 0], sizes = [1, 1], strides = [1, 1]} : vector<7x1xf32> to vector<1x1xf32>
    %38 = vector.extract %37[0, 0] : f32 from vector<1x1xf32>
    %39 = vector.extract_strided_slice %22 {offsets = [1, 0], sizes = [1, 1], strides = [1, 1]} : vector<7x1xf32> to vector<1x1xf32>
    %40 = vector.extract %39[0, 0] : f32 from vector<1x1xf32>
    %41 = vector.extract_strided_slice %22 {offsets = [2, 0], sizes = [1, 1], strides = [1, 1]} : vector<7x1xf32> to vector<1x1xf32>
    %42 = vector.extract %41[0, 0] : f32 from vector<1x1xf32>
    %43 = vector.extract_strided_slice %22 {offsets = [3, 0], sizes = [1, 1], strides = [1, 1]} : vector<7x1xf32> to vector<1x1xf32>
    %44 = vector.extract %43[0, 0] : f32 from vector<1x1xf32>
    %45 = vector.extract_strided_slice %22 {offsets = [4, 0], sizes = [1, 1], strides = [1, 1]} : vector<7x1xf32> to vector<1x1xf32>
    %46 = vector.extract %45[0, 0] : f32 from vector<1x1xf32>
    %47 = vector.extract_strided_slice %22 {offsets = [5, 0], sizes = [1, 1], strides = [1, 1]} : vector<7x1xf32> to vector<1x1xf32>
    %48 = vector.extract %47[0, 0] : f32 from vector<1x1xf32>
    %49 = vector.extract_strided_slice %22 {offsets = [6, 0], sizes = [1, 1], strides = [1, 1]} : vector<7x1xf32> to vector<1x1xf32>
    %50 = vector.extract %49[0, 0] : f32 from vector<1x1xf32>
    %cst_5 = arith.constant 2.400000e+01 : f32
    %cst_6 = arith.constant 2.400000e+01 : f32
    %51 = arith.addf %cst_5, %cst_6 : f32
    %cst_7 = arith.constant 2.400000e+01 : f32
    %52 = arith.divf %24, %cst_7 : f32
    %cst_8 = arith.constant 2.400000e+01 : f32
    %53 = arith.divf %38, %cst_8 : f32
    %54 = arith.addf %24, %38 : f32
    %55 = arith.divf %54, %51 : f32
    %56 = arith.addf %26, %40 : f32
    %57 = arith.divf %56, %51 : f32
    %cst_9 = arith.constant 2.400000e+01 : f32
    %58 = arith.divf %26, %cst_9 : f32
    %cst_10 = arith.constant 2.400000e+01 : f32
    %59 = arith.divf %40, %cst_10 : f32
    %cst_11 = arith.constant 2.400000e+01 : f32
    %60 = arith.mulf %cst_11, %58 : f32
    %61 = arith.mulf %60, %58 : f32
    %62 = arith.subf %24, %61 : f32
    %cst_12 = arith.constant 0.000000e+00 : f32
    %63 = arith.maximumf %62, %cst_12 : f32
    %cst_13 = arith.constant 2.400000e+01 : f32
    %cst_14 = arith.constant 1.000000e+00 : f32
    %64 = arith.subf %cst_13, %cst_14 : f32
    %65 = arith.divf %63, %64 : f32
    %66 = math.sqrt %65 : f32
    %cst_15 = arith.constant 2.400000e+01 : f32
    %67 = arith.mulf %cst_15, %59 : f32
    %68 = arith.mulf %67, %59 : f32
    %69 = arith.subf %38, %68 : f32
    %cst_16 = arith.constant 0.000000e+00 : f32
    %70 = arith.maximumf %69, %cst_16 : f32
    %cst_17 = arith.constant 2.400000e+01 : f32
    %cst_18 = arith.constant 1.000000e+00 : f32
    %71 = arith.subf %cst_17, %cst_18 : f32
    %72 = arith.divf %70, %71 : f32
    %73 = math.sqrt %72 : f32
    %74 = arith.mulf %28, %28 : f32
    %cst_19 = arith.constant 2.400000e+01 : f32
    %75 = arith.divf %74, %cst_19 : f32
    %76 = arith.subf %30, %75 : f32
    %cst_20 = arith.constant 0.000000e+00 : f32
    %77 = arith.maximumf %76, %cst_20 : f32
    %cst_21 = arith.constant 2.400000e+01 : f32
    %cst_22 = arith.constant 1.000000e+00 : f32
    %78 = arith.subf %cst_21, %cst_22 : f32
    %79 = arith.divf %77, %78 : f32
    %80 = math.sqrt %79 : f32
    %81 = arith.mulf %42, %42 : f32
    %cst_23 = arith.constant 2.400000e+01 : f32
    %82 = arith.divf %81, %cst_23 : f32
    %83 = arith.subf %44, %82 : f32
    %cst_24 = arith.constant 0.000000e+00 : f32
    %84 = arith.maximumf %83, %cst_24 : f32
    %cst_25 = arith.constant 2.400000e+01 : f32
    %cst_26 = arith.constant 1.000000e+00 : f32
    %85 = arith.subf %cst_25, %cst_26 : f32
    %86 = arith.divf %84, %85 : f32
    %87 = math.sqrt %86 : f32
    %88 = arith.addf %32, %46 : f32
    %89 = arith.addf %28, %42 : f32
    %90 = arith.addf %34, %48 : f32
    %91 = arith.addf %36, %50 : f32
    %92 = arith.addf %30, %44 : f32
    %93 = arith.mulf %88, %89 : f32
    %94 = arith.divf %93, %51 : f32
    %95 = arith.subf %90, %94 : f32
    %96 = arith.mulf %88, %88 : f32
    %97 = arith.divf %96, %51 : f32
    %98 = arith.subf %91, %97 : f32
    %cst_27 = arith.constant 0.000000e+00 : f32
    %99 = arith.maximumf %98, %cst_27 : f32
    %100 = math.sqrt %99 : f32
    %101 = arith.mulf %89, %89 : f32
    %102 = arith.divf %101, %51 : f32
    %103 = arith.subf %92, %102 : f32
    %cst_28 = arith.constant 0.000000e+00 : f32
    %104 = arith.maximumf %103, %cst_28 : f32
    %105 = math.sqrt %104 : f32
    %106 = arith.mulf %100, %105 : f32
    %107 = arith.divf %95, %106 : f32
    %c0_29 = arith.constant 0 : index
    %108 = memref.load %arg2[%c0_29] : memref<16xf32, #tpu.memory_space<smem>>
    memref.store %52, %arg2[%c0_29] : memref<16xf32, #tpu.memory_space<smem>>
    %c1 = arith.constant 1 : index
    %109 = memref.load %arg2[%c1] : memref<16xf32, #tpu.memory_space<smem>>
    memref.store %53, %arg2[%c1] : memref<16xf32, #tpu.memory_space<smem>>
    %c2 = arith.constant 2 : index
    %110 = memref.load %arg2[%c2] : memref<16xf32, #tpu.memory_space<smem>>
    memref.store %55, %arg2[%c2] : memref<16xf32, #tpu.memory_space<smem>>
    %c3 = arith.constant 3 : index
    %111 = memref.load %arg2[%c3] : memref<16xf32, #tpu.memory_space<smem>>
    memref.store %57, %arg2[%c3] : memref<16xf32, #tpu.memory_space<smem>>
    %c4 = arith.constant 4 : index
    %112 = memref.load %arg2[%c4] : memref<16xf32, #tpu.memory_space<smem>>
    memref.store %58, %arg2[%c4] : memref<16xf32, #tpu.memory_space<smem>>
    %c5 = arith.constant 5 : index
    %113 = memref.load %arg2[%c5] : memref<16xf32, #tpu.memory_space<smem>>
    memref.store %66, %arg2[%c5] : memref<16xf32, #tpu.memory_space<smem>>
    %c6 = arith.constant 6 : index
    %114 = memref.load %arg2[%c6] : memref<16xf32, #tpu.memory_space<smem>>
    memref.store %59, %arg2[%c6] : memref<16xf32, #tpu.memory_space<smem>>
    %c7 = arith.constant 7 : index
    %115 = memref.load %arg2[%c7] : memref<16xf32, #tpu.memory_space<smem>>
    memref.store %73, %arg2[%c7] : memref<16xf32, #tpu.memory_space<smem>>
    %116 = arith.divf %58, %80 : f32
    %c8 = arith.constant 8 : index
    %117 = memref.load %arg2[%c8] : memref<16xf32, #tpu.memory_space<smem>>
    memref.store %116, %arg2[%c8] : memref<16xf32, #tpu.memory_space<smem>>
    %118 = arith.divf %66, %80 : f32
    %c9 = arith.constant 9 : index
    %119 = memref.load %arg2[%c9] : memref<16xf32, #tpu.memory_space<smem>>
    memref.store %118, %arg2[%c9] : memref<16xf32, #tpu.memory_space<smem>>
    %120 = arith.divf %59, %87 : f32
    %c10 = arith.constant 10 : index
    %121 = memref.load %arg2[%c10] : memref<16xf32, #tpu.memory_space<smem>>
    memref.store %120, %arg2[%c10] : memref<16xf32, #tpu.memory_space<smem>>
    %122 = arith.divf %73, %87 : f32
    %c11 = arith.constant 11 : index
    %123 = memref.load %arg2[%c11] : memref<16xf32, #tpu.memory_space<smem>>
    memref.store %122, %arg2[%c11] : memref<16xf32, #tpu.memory_space<smem>>
    %c12 = arith.constant 12 : index
    %124 = memref.load %arg2[%c12] : memref<16xf32, #tpu.memory_space<smem>>
    memref.store %107, %arg2[%c12] : memref<16xf32, #tpu.memory_space<smem>>
    %cst_30 = arith.constant 0.000000e+00 : f32
    %c13 = arith.constant 13 : index
    %125 = memref.load %arg2[%c13] : memref<16xf32, #tpu.memory_space<smem>>
    memref.store %cst_30, %arg2[%c13] : memref<16xf32, #tpu.memory_space<smem>>
    %cst_31 = arith.constant 0.000000e+00 : f32
    %c14 = arith.constant 14 : index
    %126 = memref.load %arg2[%c14] : memref<16xf32, #tpu.memory_space<smem>>
    memref.store %cst_31, %arg2[%c14] : memref<16xf32, #tpu.memory_space<smem>>
    %cst_32 = arith.constant 0.000000e+00 : f32
    %c15 = arith.constant 15 : index
    %127 = memref.load %arg2[%c15] : memref<16xf32, #tpu.memory_space<smem>>
    memref.store %cst_32, %arg2[%c15] : memref<16xf32, #tpu.memory_space<smem>>
    return
  }
}

</mosaic_0001>

<bundles_post_ra>
// kernel: tpu_custom_call.1
= control target key start
LH: loop header
LB: loop body
LE: loop exit
PB: predicated region body
PF: predicated region fallthrough
CT: control target
= control target key end

     0   :  { %7 = vsyncpa [#allocation3], 0  ;;  %s907_s0 = inlined_call_operand.hbm [shape: f32[6,8], index: 0, kind: input, shape index: {}]   ;;  %s908_s1 = inlined_call_operand.hbm [shape: f32[6,8], index: 1, kind: input, shape index: {}]   ;;  %s909_s2 = inlined_call_operand.hbm [shape: f32[16], index: 2, kind: output, shape index: {}]  }
   0x1   :  { %8 = vsyncpa [#allocation6], 0 }
   0x2   :  { %9 = vsyncpa [#allocation4], 0  ;;  %s15_s11 = sshll.u32 %s907_s0, 4  ;;  %s679_s12 = smov [#allocation2]   ;;  %s16_s11 = int_to_ptr.hbm [resolvable:$true] %s15_s11 }
   0x3   :  { %s17_s13 = sshll.u32 %s679_s12, 4  ;;  %s26_s16 = sshll.u32 %s908_s1, 4  ;;  %s18_s13 = int_to_ptr.vmem [resolvable:$true] %s17_s13  ;;  %s27_s16 = int_to_ptr.hbm [resolvable:$true] %s26_s16 }
   0x4   :  { %20 = dma.hbm_to_vmem [thread:$0]  %s16_s11, 128, %s18_s13, [#allocation3]  }
   0x5   :  { %s680_s17 = smov [#allocation5]  }
   0x6   :  { %s28_s18 = sshll.u32 %s680_s17, 4  ;;  %s29_s18 = int_to_ptr.vmem [resolvable:$true] %s28_s18 }
   0x7   :  { %31 = dma.hbm_to_vmem [thread:$0]  %s27_s16, 128, %s29_s18, [#allocation6]  }
   0x8   :  { %673 = dma.done.wait [#allocation3], 128  }
   0x9   :  { %674 = vsyncadd [#allocation3], 4294967168 }
   0xa   :  { %675 = dma.done.wait [#allocation6], 128  }
   0xb   :  { %676 = vsyncadd [#allocation6], 4294967168  ;;  %v40_v0 = vld [vmem:[#allocation2] sm:$0x3f]  ;;  %v41_v1 = vld [vmem:[#allocation5] sm:$0x3f]  ;;  %v77_v15 = vlaneseq }
   0xc   :  { %vm48_vm0 = vcmask 62464   ;;  %v42_v2 = vsub.f32 %v40_v0, %v41_v1  ;;  %v45_v6 = vmul.f32 %v41_v1, %v41_v1  ;;  %v46_v7 = vmul.f32 %v41_v1, %v40_v0  ;;  %s681_s0 = smov 0.0  }
   0xd   :  { %v55_v3 = vsel %vm48_vm0, %v41_v1, 0.0  ;;  %v61_v4 = vsel %vm48_vm0, %v40_v0, 0.0  ;;  %v47_v13 = vmul.f32 %v40_v0, %v40_v0  ;;  %v78_v17 = vand.u32 127, %v77_v15  ;;  %508 = sst [smem:[#allocation7 + $0xd]] %s681_s0 }
   0xe   :  { %56 = vadd.xlane.f32.xlu1 %v55_v3  ;;  %62 = vadd.xlane.f32.xlu2 %v61_v4  ;;  %v43_v5 = vmul.f32 %v42_v2, %v42_v2  ;;  %v44_v9 = vand.u32 2147483647, %v42_v2  ;;  %v58_v10 = vsel %vm48_vm0, %v45_v6, 0.0  ;;  %v64_v11 = vsel %vm48_vm0, %v46_v7, 0.0  ;;  %510 = sst [smem:[#allocation7 + $0xe]] %s681_s0 }
   0xf   :  { %v67_v14 = vsel %vm48_vm0, %v47_v13, 0.0  ;;  %v103_v20 = vadd.s32 3, %v78_v17  ;;  %vm86_vm1 = vcmask 1041409   ;;  %vm88_vm2 = vcmask 1042434   ;;  %512 = sst [smem:[#allocation7 + $0xf]] %s681_s0 }
  0x10   :  { %v49_v8 = vsel %vm48_vm0, %v43_v5, 0.0  ;;  %v52_v12 = vsel %vm48_vm0, %v44_v9, 0.0  ;;  %vm90_vm3 = vcmask 1043459   ;;  %vm92_vm4 = vcmask 1044484  }
  0x11   :  { %50 = vadd.xlane.f32.xlu0 %v49_v8  ;;  %vm94_vm5 = vcmask 1045509   ;;  %vm96_vm6 = vcmask 1046534   ;;  %vm99_vm7 = vcmask 22528   ;;  %v682_v53 = vmov 24.0  }
  0x12   :  { %589 = vrcp.f32 %v682_v53  ;;  %v683_v54 = vmov 48.0   ;;  %v684_v55 = vmov 23.0  }
  0x13   :  { %591 = vrcp.f32 %v683_v54 }
  0x14   :  { %593 = vrcp.f32 %v684_v55 }
  0x16   :  { %59 = vadd.xlane.f32.xlu1 %v58_v10  ;;  %65 = vadd.xlane.f32.xlu2 %v64_v11 }
  0x18   :  { %v590_v56 = vpop.eup %589 }
  0x19   :  { %53 = vadd.xlane.f32.xlu0 %v52_v12  ;;  %v592_v57 = vpop.eup %591  ;;  %v148_v59 = vmul.f32 24.0, %v590_v56  ;;  %vm152_vm8 = vweird.f32 %v590_v56 }
  0x1a   :  { %v594_v58 = vpop.eup %593  ;;  %v167_v60 = vmul.f32 48.0, %v592_v57  ;;  %vm171_vm9 = vweird.f32 %v592_v57 }
  0x1b   :  { %v208_v61 = vmul.f32 23.0, %v594_v58  ;;  %v149_v2 = vsub.f32 1.0, %v148_v59  ;;  %vm212_vm10 = vweird.f32 %v594_v58 }
  0x1c   :  { %v168_v4 = vsub.f32 1.0, %v167_v60 }
  0x1d   :  { %v209_v7 = vsub.f32 1.0, %v208_v61  ;;  %v150_v9 = vmul.f32 %v590_v56, %v149_v2 }
  0x1e   :  { %v169_v11 = vmul.f32 %v592_v57, %v168_v4 }
  0x1f   :  { %v210_v13 = vmul.f32 %v594_v58, %v209_v7 }
  0x21   :  { %68 = vadd.xlane.f32.xlu0 %v67_v14 }
  0x81   :  { %v57_v16 = vpop.xlane.xlu1 %56  ;;  %v63_v19 = vpop.xlane.xlu2 %62 }
  0x82   :  { %v81_v29 = vperm.slane %v57_v16, %v78_v17  ;;  %v106_v30 = vperm.slane %v57_v16, %v103_v20  ;;  %v83_v36 = vperm.slane %v63_v19, %v78_v17  ;;  %v108_v37 = vperm.slane %v63_v19, %v103_v20 }
  0x83   :  { %v151_v16 = vadd.f32 %v590_v56, %v150_v9 }
  0x84   :  { %v51_v18 = vpop.xlane.xlu0 %50 }
  0x85   :  { %v79_v22 = vperm.slane %v51_v18, %v78_v17  ;;  %v104_v23 = vperm.slane %v51_v18, %v103_v20  ;;  %v170_v18 = vadd.f32 %v592_v57, %v169_v11 }
  0x89   :  { %v60_v21 = vpop.xlane.xlu1 %59  ;;  %v66_v33 = vpop.xlane.xlu2 %65 }
  0x8a   :  { %v82_v27 = vperm.slane %v60_v21, %v78_v17  ;;  %v107_v28 = vperm.slane %v60_v21, %v103_v20  ;;  %v84_v40 = vperm.slane %v66_v33, %v78_v17  ;;  %v109_v41 = vperm.slane %v66_v33, %v103_v20 }
  0x8b   :  { %v153_v21 = vsel %vm152_vm8, %v590_v56, %v151_v16 }
  0x8c   :  { %v54_v24 = vpop.xlane.xlu0 %53 }
  0x8d   :  { %v80_v25 = vperm.slane %v54_v24, %v78_v17  ;;  %v105_v26 = vperm.slane %v54_v24, %v103_v20 }
  0x8f   :  { %v87_v31 = vsel %vm86_vm1, %v80_v25, %v79_v22  ;;  %v111_v32 = vsel %vm86_vm1, %v105_v26, %v104_v23  ;;  %v172_v22 = vsel %vm171_vm9, %v592_v57, %v170_v18 }
  0x90   :  { %v89_v34 = vsel %vm88_vm2, %v81_v29, %v87_v31  ;;  %v112_v35 = vsel %vm88_vm2, %v106_v30, %v111_v32 }
  0x91   :  { %v91_v38 = vsel %vm90_vm3, %v82_v27, %v89_v34  ;;  %v113_v39 = vsel %vm90_vm3, %v107_v28, %v112_v35 }
  0x92   :  { %v114_v42 = vsel %vm92_vm4, %v108_v37, %v113_v39  ;;  %v93_v43 = vsel %vm92_vm4, %v83_v36, %v91_v38 }
  0x93   :  { %v115_v47 = vsel %vm94_vm5, %v109_v41, %v114_v42  ;;  %v95_v48 = vsel %vm94_vm5, %v84_v40, %v93_v43 }
  0x94   :  { %v69_v44 = vpop.xlane.xlu0 %68 }
  0x95   :  { %v85_v45 = vperm.slane %v69_v44, %v78_v17  ;;  %v110_v46 = vperm.slane %v69_v44, %v103_v20  ;;  %v211_v20 = vadd.f32 %v594_v58, %v210_v13 }
  0x97   :  { %v116_v49 = vsel %vm96_vm6, %v110_v46, %v115_v47  ;;  %v97_v50 = vsel %vm96_vm6, %v85_v45, %v95_v48  ;;  %v213_v23 = vsel %vm212_vm10, %v594_v58, %v211_v20 }
  0x98   :  { %v118_v51 = vsel %vm99_vm7, %v116_v49, 0.0  ;;  %v100_v52 = vsel %vm99_vm7, %v97_v50, 0.0 }
  0x99   :  { %119 = vadd.xlane.f32.xlu2 %v118_v51  ;;  %101 = vadd.xlane.f32.xlu1 %v100_v52 }
 0x10c   :  { %v102_v62 = vpop.xlane.xlu1 %101  ;;  %v120_v5 = vpop.xlane.xlu2 %119 }
 0x10d   :  { %530 = vpush %v102_v62  ;;  %v122_v63 = vrot.slane %v102_v62, 1  ;;  %v124_v0 = vrot.slane %v102_v62, 2  ;;  %v126_v1 = vrot.slane %v102_v62, 3  ;;  %v128_v3 = vrot.slane %v102_v62, 4 }
 0x10e   :  { %v130_v6 = vrot.slane %v102_v62, 5  ;;  %v132_v8 = vrot.slane %v102_v62, 6  ;;  %v135_v10 = vrot.slane %v120_v5, 1  ;;  %v137_v12 = vrot.slane %v120_v5, 2 }
 0x10f   :  { %532 = vpush %v122_v63  ;;  %v139_v14 = vrot.slane %v120_v5, 3  ;;  %v141_v15 = vrot.slane %v120_v5, 4  ;;  %v143_v17 = vrot.slane %v120_v5, 5  ;;  %v145_v19 = vrot.slane %v120_v5, 6 }
 0x110   :  { %534 = vpush %v124_v0 }
 0x111   :  { %536 = vpush %v126_v1 }
 0x112   :  { %538 = vpush %v128_v3 }
 0x113   :  { %540 = vpush %v130_v6 }
 0x114   :  { %542 = vpush %v132_v8 }
 0x115   :  { %544 = vpush %v120_v5 }
 0x116   :  { %546 = vpush %v135_v10 }
 0x117   :  { %548 = vpush %v137_v12 }
 0x118   :  { %550 = vpush %v139_v14 }
 0x119   :  { %552 = vpush %v141_v15 }
 0x11a   :  { %554 = vpush %v143_v17 }
 0x11b   :  { %556 = vpush %v145_v19 }
 0x11c   :  { %558 = vpush %v153_v21 }
 0x11d   :  { %560 = vpush %v172_v22 }
 0x11e   :  { %562 = vpush %v213_v23 }
 0x13e   :  { %s717_s1 = spop %530 }
 0x140   :  { %s719_s19 = spop %532 }
 0x141   :  { %s721_s20 = spop %534 }
 0x142   :  { %s723_s21 = spop %536 }
 0x143   :  { %s539_s22 = spop %538 }
 0x144   :  { %s725_s23 = spop %540 }
 0x145   :  { %s727_s24 = spop %542 }
 0x146   :  { %s729_s25 = spop %544 }
 0x147   :  { %s731_s26 = spop %546  ;;  %s165_s27 = sadd.f32 %s729_s25, %s717_s1 }
 0x148   :  { %s735_s28 = spop %548  ;;  %s175_s5 = sadd.f32 %s731_s26, %s719_s19 }
 0x149   :  { %s741_s30 = sadd.f32 %s735_s28, %s721_s20  ;;  %s745_s4 = spop %550 }
 0x14a   :  { %s331_s7 = sadd.f32 %s745_s4, %s723_s21  ;;  %s553_s8 = spop %552 }
 0x14b   :  { %s369_s6 = smul.f32 %s741_s30, %s741_s30  ;;  %s753_s9 = sadd.f32 %s553_s8, %s539_s22 }
 0x14c   :  { %s755_s10 = spop %554 }
 0x14d   :  { %s557_s12 = spop %556  ;;  %s343_s15 = smul.f32 %s753_s9, %s753_s9 }
 0x14e   :  { %s330_s14 = sadd.f32 %s557_s12, %s727_s24  ;;  %s764_s16 = spop %558 }
 0x14f   :  { %s155_s17 = smul.f32 %s764_s16, %s717_s1  ;;  %s768_s18 = spop %560 }
 0x150   :  { %s164_s22 = smul.f32 %s764_s16, %s729_s25  ;;  %s772_s8 = spop %562 }
 0x151   :  { %s776_s11 = smul.f32 %s764_s16, %s719_s19  ;;  %414 = sst [smem:[#allocation7]] %s155_s17 }
 0x152   :  { %s780_s24 = smul.f32 %s764_s16, %s731_s26  ;;  %416 = sst [smem:[#allocation7 + $0x1]] %s164_s22 }
 0x153   :  { %422 = sst [smem:[#allocation7 + $0x4]] %s776_s11  ;;  %s174_s12 = smul.f32 %s768_s18, %s165_s27 }
 0x154   :  { %426 = sst [smem:[#allocation7 + $0x6]] %s780_s24  ;;  %s184_s13 = smul.f32 %s768_s18, %s175_s5 }
 0x155   :  { %s352_s19 = smul.f32 %s768_s18, %s343_s15  ;;  %418 = sst [smem:[#allocation7 + $0x2]] %s174_s12 }
 0x156   :  { %s378_s3 = smul.f32 %s768_s18, %s369_s6  ;;  %420 = sst [smem:[#allocation7 + $0x3]] %s184_s13 }
 0x157   :  { %s353_s26 = ssub.f32 %s330_s14, %s352_s19  ;;  %s203_s17 = smul.f32 24.0, %s776_s11 }
 0x158   :  { %s379_s22 = ssub.f32 %s331_s7, %s378_s3  ;;  %s230_s27 = smul.f32 24.0, %s780_s24 }
 0x159   :  { %s354_s29 = smax.f32 %s681_s0, %s353_s26  ;;  %s204_s5 = smul.f32 %s203_s17, %s776_s11 }
 0x15a   :  { %v792_v24 = vstv %s354_s29  ;;  %s380_s15 = smax.f32 %s681_s0, %s379_s22  ;;  %s231_s6 = smul.f32 %s230_s27, %s780_s24 }
 0x15b   :  { %v796_v25 = vstv %s380_s15  ;;  %s205_s13 = ssub.f32 %s717_s1, %s204_s5  ;;  %s910_s14 = smul.f32 %s721_s20, %s721_s20  ;;  %595 = vrsqrt.f32 %v792_v24  ;;  %vm363_vm1 = vcmp.eq.f32.partialorder %v792_v24, inf  ;;  %v366_v20 = vand.u32 2147483648, %v792_v24 }
 0x15c   :  { %s232_s3 = ssub.f32 %s729_s25, %s231_s6  ;;  %s911_s7 = smul.f32 %s735_s28, %s735_s28  ;;  %597 = vrsqrt.f32 %v796_v25  ;;  %vm389_vm3 = vcmp.eq.f32.partialorder %v796_v25, inf  ;;  %vm365_vm5 = vcmp.eq.f32.partialorder %v792_v24, 0.0  ;;  %v392_v23 = vand.u32 2147483648, %v796_v25 }
 0x15d   :  { %s266_s12 = smul.f32 %s764_s16, %s910_s14  ;;  %s206_s29 = smax.f32 %s681_s0, %s205_s13  ;;  %vm391_vm6 = vcmp.eq.f32.partialorder %v796_v25, 0.0 }
 0x15e   :  { %s301_s19 = smul.f32 %s764_s16, %s911_s7  ;;  %s233_s22 = smax.f32 %s681_s0, %s232_s3 }
 0x15f   :  { %s267_s26 = ssub.f32 %s723_s21, %s266_s12  ;;  %s215_s17 = smul.f32 %s772_s8, %s206_s29 }
 0x160   :  { %s242_s1 = smul.f32 %s772_s8, %s233_s22  ;;  %s302_s25 = ssub.f32 %s745_s4, %s301_s19 }
 0x161   :  { %s268_s20 = smax.f32 %s681_s0, %s267_s26  ;;  %v816_v26 = vstv %s215_s17  ;;  %v596_v27 = vpop.eup %595  ;;  %s912_s28 = smul.f32 %s741_s30, %s753_s9 }
 0x162   :  { %s277_s27 = smul.f32 %s772_s8, %s268_s20  ;;  %599 = vrsqrt.f32 %v816_v26  ;;  %v821_v28 = vstv %s242_s1  ;;  %v598_v29 = vpop.eup %597  ;;  %s303_s16 = smax.f32 %s681_s0, %s302_s25  ;;  %v357_v31 = vmul.f32 %v596_v27, %v792_v24  ;;  %vm224_vm11 = vcmp.eq.f32.partialorder %v816_v26, inf }
 0x163   :  { %s341_s21 = smul.f32 %s768_s18, %s912_s28  ;;  %601 = vrsqrt.f32 %v821_v28  ;;  %s913_s15 = sadd.f32 %s755_s10, %s725_s23  ;;  %v383_v32 = vmul.f32 %v598_v29, %v796_v25  ;;  %vm226_vm12 = vcmp.eq.f32.partialorder %v816_v26, 0.0  ;;  %v227_v60 = vand.u32 2147483648, %v816_v26 }
 0x164   :  { %v828_v30 = vstv %s277_s27  ;;  %s312_s5 = smul.f32 %s772_s8, %s303_s16  ;;  %v358_v35 = vmul.f32 %v596_v27, %v357_v31  ;;  %vm251_vm13 = vcmp.eq.f32.partialorder %v821_v28, inf  ;;  %vm253_vm14 = vcmp.eq.f32.partialorder %v821_v28, 0.0  ;;  %s518_s14 = sshll.u32 %s909_s2, 4  ;;  %s519_s14 = int_to_ptr.hbm [resolvable:$true] %s518_s14 }
 0x165   :  { %603 = vrsqrt.f32 %v828_v30  ;;  %s836_s6 = ssub.f32 %s913_s15, %s341_s21  ;;  %v384_v36 = vmul.f32 %v598_v29, %v383_v32  ;;  %v254_v3 = vand.u32 2147483648, %v821_v28  ;;  %vm286_vm15 = vcmp.eq.f32.partialorder %v828_v30, inf  ;;  %s685_s1 = smov [#allocation7]  }
 0x166   :  { %v840_v33 = vstv %s312_s5  ;;  %v359_v41 = vmul.f32 0.5, %v358_v35  ;;  %v289_v7 = vand.u32 2147483648, %v828_v30  ;;  %vm288_vm0 = vcmp.eq.f32.partialorder %v828_v30, 0.0 }
 0x167   :  { %605 = vrsqrt.f32 %v840_v33  ;;  %v385_v42 = vmul.f32 0.5, %v384_v36  ;;  %vm321_vm2 = vcmp.eq.f32.partialorder %v840_v33, inf  ;;  %v324_v17 = vand.u32 2147483648, %v840_v33 }
 0x168   :  { %v600_v34 = vpop.eup %599  ;;  %v360_v49 = vsub.f32 1.5, %v359_v41  ;;  %vm323_vm4 = vcmp.eq.f32.partialorder %v840_v33, 0.0 }
 0x169   :  { %v602_v37 = vpop.eup %601  ;;  %v218_v38 = vmul.f32 %v600_v34, %v816_v26  ;;  %v386_v52 = vsub.f32 1.5, %v385_v42 }
 0x16a   :  { %v245_v40 = vmul.f32 %v602_v37, %v821_v28  ;;  %v361_v59 = vmul.f32 %v596_v27, %v360_v49 }
 0x16b   :  { %v604_v39 = vpop.eup %603  ;;  %v219_v43 = vmul.f32 %v600_v34, %v218_v38  ;;  %v387_v63 = vmul.f32 %v598_v29, %v386_v52 }
 0x16c   :  { %v280_v44 = vmul.f32 %v604_v39, %v828_v30  ;;  %v246_v45 = vmul.f32 %v602_v37, %v245_v40  ;;  %v362_v8 = vmul.f32 %v361_v59, %v792_v24 }
 0x16d   :  { %v606_v46 = vpop.eup %605  ;;  %v220_v47 = vmul.f32 0.5, %v219_v43  ;;  %v388_v12 = vmul.f32 %v387_v63, %v796_v25 }
 0x16e   :  { %v281_v48 = vmul.f32 %v604_v39, %v280_v44  ;;  %v247_v50 = vmul.f32 0.5, %v246_v45  ;;  %v315_v51 = vmul.f32 %v606_v46, %v840_v33  ;;  %v364_v18 = vsel %vm363_vm1, %v792_v24, %v362_v8 }
 0x16f   :  { %v221_v53 = vsub.f32 1.5, %v220_v47  ;;  %v390_v21 = vsel %vm389_vm3, %v796_v25, %v388_v12 }
 0x170   :  { %v282_v54 = vmul.f32 0.5, %v281_v48  ;;  %v248_v55 = vsub.f32 1.5, %v247_v50  ;;  %v316_v56 = vmul.f32 %v606_v46, %v315_v51  ;;  %v393_v27 = vsel %vm391_vm6, %v392_v23, %v390_v21 }
 0x171   :  { %v222_v57 = vmul.f32 %v600_v34, %v221_v53 }
 0x172   :  { %v283_v58 = vsub.f32 1.5, %v282_v54  ;;  %v249_v61 = vmul.f32 %v602_v37, %v248_v55  ;;  %v317_v62 = vmul.f32 0.5, %v316_v56 }
 0x173   :  { %v223_v0 = vmul.f32 %v222_v57, %v816_v26 }
 0x174   :  { %v284_v1 = vmul.f32 %v604_v39, %v283_v58  ;;  %v250_v2 = vmul.f32 %v249_v61, %v821_v28  ;;  %v318_v4 = vsub.f32 1.5, %v317_v62 }
 0x175   :  { %v225_v5 = vsel %vm224_vm11, %v816_v26, %v223_v0  ;;  %v367_v26 = vsel %vm365_vm5, %v366_v20, %v364_v18 }
 0x176   :  { %v285_v6 = vmul.f32 %v284_v1, %v828_v30  ;;  %v228_v9 = vsel %vm226_vm12, %v227_v60, %v225_v5  ;;  %v252_v10 = vsel %vm251_vm13, %v821_v28, %v250_v2  ;;  %v319_v11 = vmul.f32 %v606_v46, %v318_v4 }
 0x177   :  { %564 = vpush %v228_v9  ;;  %v255_v13 = vsel %vm253_vm14, %v254_v3, %v252_v10 }
 0x178   :  { %v287_v14 = vsel %vm286_vm15, %v828_v30, %v285_v6  ;;  %566 = vpush %v255_v13  ;;  %v320_v16 = vmul.f32 %v319_v11, %v840_v33 }
 0x179   :  { %v290_v15 = vsel %vm288_vm0, %v289_v7, %v287_v14 }
 0x17a   :  { %568 = vpush %v290_v15  ;;  %v322_v19 = vsel %vm321_vm2, %v840_v33, %v320_v16 }
 0x17b   :  { %v325_v22 = vsel %vm323_vm4, %v324_v17, %v322_v19 }
 0x17c   :  { %570 = vpush %v325_v22 }
 0x17d   :  { %572 = vpush %v367_v26 }
 0x17e   :  { %574 = vpush %v393_v27 }
 0x1a8   :  { %s881_s0 = spop %564 }
 0x1a9   :  { %424 = sst [smem:[#allocation7 + $0x5]] %s881_s0  ;;  %s884_s23 = spop %566 }
 0x1aa   :  { %428 = sst [smem:[#allocation7 + $0x7]] %s884_s23 }
 0x1ab   :  { %s569_s30 = spop %568 }
 0x1ac   :  { %v429_v28 = vstv %s569_s30 }
 0x1ad   :  { %607 = vrcp.f32 %v429_v28  ;;  %s571_s4 = spop %570  ;;  %vm435_vm7 = vweird.f32 %v429_v28  ;;  %v441_v42 = vand.u32 2147483648, %v429_v28  ;;  %v439_v47 = vand.u32 2147483647, %v429_v28 }
 0x1ae   :  { %v467_v24 = vstv %s571_s4  ;;  %s573_s9 = spop %572 }
 0x1af   :  { %609 = vrcp.f32 %v467_v24  ;;  %s575_s10 = spop %574  ;;  %vm473_vm12 = vweird.f32 %v467_v24  ;;  %v479_v48 = vand.u32 2147483648, %v467_v24  ;;  %v477_v51 = vand.u32 2147483647, %v467_v24 }
 0x1b0   :  { %s395_s18 = smul.f32 %s575_s10, %s573_s9  ;;  %v442_v55 = vor.u32 1.1754944e-38, %v441_v42  ;;  %vm440_vm1 = vcmp.eq.f32.partialorder %v439_v47, 8.507059e+37 }
 0x1b1   :  { %v480_v58 = vor.u32 1.1754944e-38, %v479_v48  ;;  %vm478_vm2 = vcmp.eq.f32.partialorder %v477_v51, 8.507059e+37 }
 0x1b2   :  { %v396_v29 = vstv %s395_s18 }
 0x1b3   :  { %v608_v25 = vpop.eup %607  ;;  %611 = vrcp.f32 %v396_v29  ;;  %v408_v40 = vand.u32 2147483648, %v396_v29  ;;  %v406_v44 = vand.u32 2147483647, %v396_v29  ;;  %vm402_vm13 = vweird.f32 %v396_v29 }
 0x1b4   :  { %v431_v30 = vmul.f32 %v608_v25, %v429_v28  ;;  %vm436_vm8 = vweird.f32 %v608_v25 }
 0x1b5   :  { %v610_v31 = vpop.eup %609  ;;  %vm887_vm11 = vmor %vm435_vm7, %vm436_vm8  ;;  %v409_v52 = vor.u32 1.1754944e-38, %v408_v40  ;;  %vm407_vm0 = vcmp.eq.f32.partialorder %v406_v44, 8.507059e+37 }
 0x1b6   :  { %v432_v32 = vsub.f32 1.0, %v431_v30  ;;  %v469_v33 = vmul.f32 %v610_v31, %v467_v24  ;;  %vm474_vm9 = vweird.f32 %v610_v31 }
 0x1b7   :  { %vm891_vm14 = vmor %vm473_vm12, %vm474_vm9 }
 0x1b8   :  { %v470_v34 = vsub.f32 1.0, %v469_v33  ;;  %v433_v36 = vmul.f32 %v608_v25, %v432_v32 }
 0x1b9   :  { %v612_v35 = vpop.eup %611 }
 0x1ba   :  { %v398_v37 = vmul.f32 %v612_v35, %v396_v29  ;;  %v471_v38 = vmul.f32 %v610_v31, %v470_v34  ;;  %v434_v41 = vadd.f32 %v608_v25, %v433_v36  ;;  %vm403_vm10 = vweird.f32 %v612_v35 }
 0x1bb   :  { %vm404_vm15 = vmor %vm402_vm13, %vm403_vm10 }
 0x1bc   :  { %v399_v39 = vsub.f32 1.0, %v398_v37  ;;  %v472_v45 = vadd.f32 %v610_v31, %v471_v38  ;;  %v438_v53 = vsel %vm887_vm11, %v608_v25, %v434_v41 }
 0x1bd   :  { %v443_v59 = vsel %vm440_vm1, %v442_v55, %v438_v53 }
 0x1be   :  { %v400_v43 = vmul.f32 %v612_v35, %v399_v39  ;;  %v476_v56 = vsel %vm891_vm14, %v610_v31, %v472_v45 }
 0x1bf   :  { %v481_v60 = vsel %vm478_vm2, %v480_v58, %v476_v56 }
 0x1c0   :  { %v401_v49 = vadd.f32 %v612_v35, %v400_v43 }
 0x1c2   :  { %v405_v54 = vsel %vm404_vm15, %v612_v35, %v401_v49 }
 0x1c3   :  { %v410_v57 = vsel %vm407_vm0, %v409_v52, %v405_v54 }
 0x1c4   :  { %576 = vpush %v410_v57 }
 0x1c5   :  { %578 = vpush %v443_v59 }
 0x1c6   :  { %580 = vpush %v481_v60 }
 0x1f5   :  { %s577_s12 = spop %576 }
 0x1f6   :  { %s412_s3 = smul.f32 %s577_s12, %s836_s6  ;;  %s579_s7 = spop %578 }
 0x1f7   :  { %s445_s19 = smul.f32 %s579_s7, %s776_s11  ;;  %s581_s29 = spop %580 }
 0x1f8   :  { %506 = sst [smem:[#allocation7 + $0xc]] %s412_s3  ;;  %s464_s26 = smul.f32 %s579_s7, %s881_s0 }
 0x1f9   :  { %447 = sst [smem:[#allocation7 + $0x8]] %s445_s19  ;;  %s483_s17 = smul.f32 %s581_s29, %s780_s24 }
 0x1fa   :  { %466 = sst [smem:[#allocation7 + $0x9]] %s464_s26  ;;  %s502_s22 = smul.f32 %s581_s29, %s884_s23 }
 0x1fb   :  { %485 = sst [smem:[#allocation7 + $0xa]] %s483_s17 }
 0x1fc   :  { %504 = sst [smem:[#allocation7 + $0xb]] %s502_s22 }
 0x1fd   :  { %521 = dma.smem_to_hbm %s685_s1, 16, %s519_s14, [#allocation4]  }
 0x1fe   :  { %677 = dma.done.wait [#allocation4], 16  }
 0x1ff   :  { %678 = vsyncadd [#allocation4], 4294967280 }
 0x200   :  { %526 = sfence }
 0x201   :  { %527 = vsyncpa [#allocation3], 1 }
 0x202   :  { %528 = vsyncpa [#allocation6], 1 }
 0x203   :  { %529 = vsyncpa [#allocation4], 1 }

</bundles_post_ra>
